<compile_context>
chip_gen: v6e
topology: v6e:2x2x1
jax: 0.10.0
libtpu: 0.0.40
codegen_flags: <defaults>
</compile_context>

<pallas_src>
import math

import jax
import jax.numpy as jnp
from jax.experimental import pallas as pl
from jax.experimental.pallas import tpu as pltpu


def _round_down_multiple(x: int, m: int) -> int:
    return (x // m) * m


def _make_concat_kernel(channel_sizes):
    """Kernel body: copy each input tile to its (static) channel offset."""
    offsets = []
    off = 0
    for c in channel_sizes:
        offsets.append(off)
        off += c

    def kernel(*refs):
        out_ref = refs[-1]
        in_refs = refs[:-1]
        for r, o, c in zip(in_refs, offsets, channel_sizes):
            out_ref[:, o:o + c, :] = r[...]

    return kernel


def concat(xs, dimension: int = 1, *, target_tile_bytes: int = 4 * 1024 * 1024):
    """torch.cat(xs, dim=dimension) for a list of same-rank arrays (Pallas TPU)."""
    xs = list(xs)
    assert len(xs) >= 1, "need at least one input"
    ndim = xs[0].ndim
    d = dimension if dimension >= 0 else dimension + ndim
    assert 0 <= d < ndim
    dtype = xs[0].dtype
    base = xs[0].shape
    for x in xs:
        assert x.ndim == ndim and x.dtype == dtype, "rank/dtype must match"
        for ax in range(ndim):
            if ax != d:
                assert x.shape[ax] == base[ax], "non-concat dims must match"

    out_shape_full = base[:d] + (sum(x.shape[d] for x in xs),) + base[d + 1:]

    # Drop zero-sized pieces (torch.cat allows them; they contribute nothing).
    xs = [x for x in xs if x.shape[d] > 0]
    if len(xs) == 0:
        return jnp.zeros(out_shape_full, dtype=dtype)
    if len(xs) == 1:
        return xs[0].reshape(out_shape_full)
    sizes = [x.shape[d] for x in xs]
    c_total = sum(sizes)

    # Collapse to 3-D slabs (pre, C_i, post); `post` maps onto the lane axis.
    pre = math.prod(base[:d]) if d > 0 else 1
    post = math.prod(base[d + 1:]) if d + 1 < ndim else 1
    xs3 = [x.reshape(pre, c, post) for x, c in zip(xs, sizes)]

    itemsize = jnp.dtype(dtype).itemsize

    # --- Tile-size policy: bytes-targeted, lane-aligned, VMEM-capped --------
    # Lane (column) tile: prefer the full `post` extent when a single-row
    # full-post output tile fits the byte budget (no ragged trailing block);
    # otherwise a multiple of 128 sized so one output tile is ~target bytes.
    # Partial last blocks (if any) are handled by Pallas with masked stores
    # only at the boundary.
    full_post_tile_bytes = c_total * post * itemsize
    if post <= 128 or full_post_tile_bytes <= target_tile_bytes:
        tc = post
    else:
        tc = target_tile_bytes // max(1, c_total * itemsize)
        tc = max(128, _round_down_multiple(tc, 128))
        tc = min(tc, max(128, _round_down_multiple(post, 128)))
    n_col = pl.cdiv(post, tc)

    # Row (pre/batch) tile: only grow when a single-row step would be tiny,
    # so per-step work amortizes the ~0.35 us grid-step overhead.
    tile_bytes = c_total * tc * itemsize
    tp = max(1, min(pre, target_tile_bytes // max(1, tile_bytes)))
    n_row = pl.cdiv(pre, tp)

    kernel = _make_concat_kernel(sizes)

    in_specs = [pl.BlockSpec((tp, c, tc), lambda i, j: (i, 0, j)) for c in sizes]
    out_specs = pl.BlockSpec((tp, c_total, tc), lambda i, j: (i, 0, j))

    out3 = pl.pallas_call(
        kernel,
        out_shape=jax.ShapeDtypeStruct((pre, c_total, post), dtype),
        grid_spec=pltpu.PrefetchScalarGridSpec(
            num_scalar_prefetch=0,
            grid=(n_row, n_col),
            in_specs=in_specs,
            out_specs=out_specs,
        ),
        compiler_params=pltpu.CompilerParams(
            dimension_semantics=("parallel", "parallel")),
    )(*xs3)

    return out3.reshape(out_shape_full)


class Concat:
    """JAX/Pallas equivalent of yolov5 Concat: forward(x) = cat(x, dim=d)."""

    def __init__(self, dimension: int = 1):
        self.d = dimension

    def __call__(self, x):
        return concat(x, self.d)


if __name__ == "__main__":
    key = jax.random.PRNGKey(0)
    k1, k2, k3 = jax.random.split(key, 3)

    # Small NCHW inputs with different channel counts, concat along dim=1
    # (the yolov5 default).
    x1 = jax.random.normal(k1, (2, 4, 16, 16), dtype=jnp.float32)
    x2 = jax.random.normal(k2, (2, 3, 16, 16), dtype=jnp.float32)

    m = Concat(dimension=1)
    y = m([x1, x2])
    y = jax.block_until_ready(y)

    # Reference check against plain JAX (exact: concat is a pure copy).
    y_ref = jnp.concatenate([x1, x2], axis=1)
    assert y.shape == y_ref.shape and y.dtype == y_ref.dtype
    assert jnp.array_equal(y, y_ref), "mismatch vs jnp.concatenate (2 inputs)"

    # Second config: three inputs, exercises multiple channel offsets.
    x3 = jax.random.normal(k3, (2, 5, 16, 16), dtype=jnp.float32)
    y2 = jax.block_until_ready(m([x1, x2, x3]))
    y2_ref = jnp.concatenate([x1, x2, x3], axis=1)
    assert jnp.array_equal(y2, y2_ref), "mismatch vs jnp.concatenate (3 inputs)"

    print("KERNEL_OK")
</pallas_src>

<mosaic_0001>
module attributes {stable_mosaic.version = 11 : i64} {
  func.func @kernel(%arg0: i32, %arg1: i32, %arg2: memref<2x4x256xf32, #tpu.memory_space<vmem>>, %arg3: memref<2x3x256xf32, #tpu.memory_space<vmem>>, %arg4: memref<2x7x256xf32, #tpu.memory_space<vmem>>) attributes {dimension_semantics = [#tpu.dimension_semantics<parallel>, #tpu.dimension_semantics<parallel>], iteration_bounds = array<i64: 1, 1>, scalar_prefetch = 0 : i64, scratch_operands = 0 : i64, tpu.core_type = #tpu.core_type<tc>, window_params = [{transform_indices = @transform_0, window_bounds = array<i64: 2, 4, 256>}, {transform_indices = @transform_1, window_bounds = array<i64: 2, 3, 256>}, {transform_indices = @transform_2, window_bounds = array<i64: 2, 7, 256>}]} {
    %c0 = arith.constant 0 : index
    %c0_0 = arith.constant 0 : index
    %c0_1 = arith.constant 0 : index
    %0 = vector.load %arg2[%c0, %c0_0, %c0_1] : memref<2x4x256xf32, #tpu.memory_space<vmem>>, vector<2x4x256xf32>
    %c0_2 = arith.constant 0 : index
    %c0_3 = arith.constant 0 : index
    %c0_4 = arith.constant 0 : index
    %1 = vector.load %arg4[%c0_2, %c0_3, %c0_4] : memref<2x7x256xf32, #tpu.memory_space<vmem>>, vector<2x4x256xf32>
    tpu.vector_store %arg4[%c0_2, %c0_3, %c0_4], %0 {strides = array<i32>} : memref<2x7x256xf32, #tpu.memory_space<vmem>>, vector<2x4x256xf32>,
    %c0_5 = arith.constant 0 : index
    %c0_6 = arith.constant 0 : index
    %c0_7 = arith.constant 0 : index
    %2 = vector.load %arg3[%c0_5, %c0_6, %c0_7] : memref<2x3x256xf32, #tpu.memory_space<vmem>>, vector<2x3x256xf32>
    %c0_8 = arith.constant 0 : index
    %c4 = arith.constant 4 : index
    %c0_9 = arith.constant 0 : index
    %3 = vector.load %arg4[%c0_8, %c4, %c0_9] : memref<2x7x256xf32, #tpu.memory_space<vmem>>, vector<2x3x256xf32>
    tpu.vector_store %arg4[%c0_8, %c4, %c0_9], %2 {strides = array<i32>} : memref<2x7x256xf32, #tpu.memory_space<vmem>>, vector<2x3x256xf32>,
    return
  }
  func.func @transform_0(%arg0: i32, %arg1: i32) -> (i32, i32, i32) {
    %c0_i32 = arith.constant 0 : i32
    %c0_i32_0 = arith.constant 0 : i32
    return %arg0, %c0_i32, %arg1 : i32, i32, i32
  }
  func.func @transform_1(%arg0: i32, %arg1: i32) -> (i32, i32, i32) {
    %c0_i32 = arith.constant 0 : i32
    %c0_i32_0 = arith.constant 0 : i32
    return %arg0, %c0_i32, %arg1 : i32, i32, i32
  }
  func.func @transform_2(%arg0: i32, %arg1: i32) -> (i32, i32, i32) {
    %c0_i32 = arith.constant 0 : i32
    %c0_i32_0 = arith.constant 0 : i32
    return %arg0, %c0_i32, %arg1 : i32, i32, i32
  }
}

</mosaic_0001>

<bundles_post_ra>
// kernel: tpu_custom_call.1
= control target key start
LH: loop header
LB: loop body
LE: loop exit
PB: predicated region body
PF: predicated region fallthrough
CT: control target
= control target key end

     0   :  { %s94_s0 = inlined_call_operand.vmem [shape: f32[2,4,256], index: 0, kind: input, shape index: {}]   ;;  %s95_s2 = inlined_call_operand.vmem [shape: f32[2,7,256], index: 2, kind: output, shape index: {}]   ;;  %s96_s1 = inlined_call_operand.vmem [shape: f32[2,3,256], index: 1, kind: input, shape index: {}]  }
   0x1   :  { %v11_v0 = vld [vmem:[%s94_s0] sm:$0xff]  ;;  %v12_v1 = vld [vmem:[%s94_s0 + $0x8] sm:$0xff] }
   0x2   :  { %v23_v2 = vld [vmem:[%s96_s1] sm:$0x77]  ;;  %19 = vst [vmem:[%s95_s2] sm:$0xf] %v11_v0  ;;  %v15_v3 = vcombine.high %v11_v0, %v11_v0  ;;  %21 = vst [vmem:[%s95_s2 + $0x10] sm:$0xf] %v12_v1  ;;  %v16_v4 = vcombine.high %v12_v1, %v12_v1 }
   0x3   :  { %v27_v5 = vcombine.low %v23_v2, %v23_v2  ;;  %32 = vst [vmem:[%s95_s2 + $0x8] sm:$0x70] %v23_v2  ;;  %v24_v6 = vld [vmem:[%s96_s1 + $0x8] sm:$0x77] }
   0x4   :  { %v28_v7 = vcombine.low %v24_v6, %v24_v6  ;;  %34 = vst [vmem:[%s95_s2 + $0x18] sm:$0x70] %v24_v6  ;;  %20 = vst [vmem:[%s95_s2 + $0x8] sm:$0xf] %v15_v3 }
   0x5   :  { %22 = vst [vmem:[%s95_s2 + $0x18] sm:$0xf] %v16_v4  ;;  %31 = vst [vmem:[%s95_s2] sm:$0x70] %v27_v5 }
   0x6   :  { %33 = vst [vmem:[%s95_s2 + $0x10] sm:$0x70] %v28_v7 }

</bundles_post_ra>
